<compile_context>
chip_gen: v6e
topology: v6e:2x2x1
jax: 0.10.0
libtpu: 0.0.40
codegen_flags: <defaults>
</compile_context>

<pallas_src>
import jax
import jax.numpy as jnp
from jax.experimental import pallas as pl
from jax.experimental.pallas import tpu as pltpu

BN_EPS = 1e-5
LANE = 128
MAX_TILE_M = 256  # cap batch tile: keeps (tile_m x H) f32 intermediate vreg/VMEM pressure sane


def classblock_kernel(x_ref, w1_ref, b1_ref, w2_ref, b2_ref, out_ref):
    # x, w1, w2 are bf16 (MXU-native); accumulate in f32; biases added in f32.
    h = jnp.dot(x_ref[...], w1_ref[...], preferred_element_type=jnp.float32) + b1_ref[...]
    h = h.astype(jnp.bfloat16)
    out = jnp.dot(h, w2_ref[...], preferred_element_type=jnp.float32) + b2_ref[...]
    out_ref[...] = out.astype(out_ref.dtype)


def _round_up(n, m):
    return ((n + m - 1) // m) * m


def _choose_tile_m(m):
    # bf16 LHS needs a sublane multiple of 16; one block for small M, 256-row tiles otherwise.
    return min(MAX_TILE_M, _round_up(m, 16))


def fold_params(p):
    """Fold eval-mode BatchNorm1d into the first Linear (in f32), lane-pad input_dim and
    class_num to multiples of 128, then cast the weight matrices to bf16."""
    scale = p["gamma"] * jax.lax.rsqrt(p["running_var"] + BN_EPS)          # (1, H)
    w1f = p["w1"] * scale                                                  # column scale (f32)
    b1f = (p["b1"] - p["running_mean"]) * scale + p["beta"]                # (1, H) f32

    D, H = w1f.shape
    C = p["w2"].shape[1]
    d_pad = _round_up(D, LANE)
    c_pad = _round_up(C, LANE)

    w1p = jnp.pad(w1f, ((0, d_pad - D), (0, 0))).astype(jnp.bfloat16)      # (Dp, H) bf16
    w2p = jnp.pad(p["w2"], ((0, 0), (0, c_pad - C))).astype(jnp.bfloat16)  # (H, Cp) bf16
    b2p = jnp.pad(p["b2"], ((0, 0), (0, c_pad - C)))                       # (1, Cp) f32
    return dict(w1=w1p, b1=b1f, w2=w2p, b2=b2p, input_dim=D, class_num=C)


def _classblock_pallas(x, folded, *, out_dtype=jnp.float32):
    """x: (Mp, Dp) bf16, already lane/sublane padded. Returns (Mp, Cp) out_dtype."""
    Mp, Dp = x.shape
    H = folded["w1"].shape[1]
    Cp = folded["w2"].shape[1]
    tile_m = _choose_tile_m(Mp)
    assert Mp % tile_m == 0
    grid = (Mp // tile_m,)

    flops = 2 * Mp * (Dp * H + H * Cp)
    bytes_accessed = (Mp * Dp * 2 + Dp * H * 2 + H * 4 + H * Cp * 2 + Cp * 4
                      + Mp * Cp * jnp.dtype(out_dtype).itemsize)
    cost = pl.CostEstimate(flops=flops, transcendentals=0, bytes_accessed=bytes_accessed)

    def build(single_buffer_weights):
        wmode = {"pipeline_mode": pl.Buffered(1)} if single_buffer_weights else {}
        return pl.pallas_call(
            classblock_kernel,
            out_shape=jax.ShapeDtypeStruct((Mp, Cp), out_dtype),
            grid=grid,
            in_specs=[
                pl.BlockSpec((tile_m, Dp), lambda i: (i, 0)),            # x batch tile (bf16)
                pl.BlockSpec((Dp, H), lambda i: (0, 0), **wmode),        # BN-folded W1 (bf16)
                pl.BlockSpec((1, H), lambda i: (0, 0), **wmode),         # BN-folded b1 (f32)
                pl.BlockSpec((H, Cp), lambda i: (0, 0), **wmode),        # lane-padded W2 (bf16)
                pl.BlockSpec((1, Cp), lambda i: (0, 0), **wmode),        # lane-padded b2 (f32)
            ],
            out_specs=pl.BlockSpec((tile_m, Cp), lambda i: (i, 0)),
            compiler_params=pltpu.CompilerParams(dimension_semantics=("parallel",)),
            cost_estimate=cost,
        )

    args = (x, folded["w1"], folded["b1"], folded["w2"], folded["b2"])
    try:
        return build(True)(*args)
    except Exception:
        # Fallback for jax versions without pipeline_mode single-buffering support.
        return build(False)(*args)


def class_block_forward(x, folded, *, out_dtype=jnp.float32):
    """x: (M, input_dim) float32. Returns (M, class_num)."""
    M, D = x.shape
    Dp = folded["w1"].shape[0]
    tile_m = _choose_tile_m(M)
    Mp = _round_up(M, tile_m)
    xb = jnp.zeros((Mp, Dp), jnp.bfloat16)
    xb = jax.lax.dynamic_update_slice(xb, x.astype(jnp.bfloat16), (0, 0))
    out = _classblock_pallas(xb, folded, out_dtype=out_dtype)
    return out[:M, :folded["class_num"]]


def multi_view_classifier_forward(f1, f2, folded, *, out_dtype=jnp.float32):
    """multi_view_net shares one ClassBlock across both views: both views' backbone
    features are written into ONE pre-padded bf16 buffer (no concat+pad HBM copies)
    and processed by a single pallas_call, then split back into (y1, y2)."""
    B, D = f1.shape
    M = 2 * B
    Dp = folded["w1"].shape[0]
    tile_m = _choose_tile_m(M)
    Mp = _round_up(M, tile_m)
    xb = jnp.zeros((Mp, Dp), jnp.bfloat16)
    xb = jax.lax.dynamic_update_slice(xb, f1.astype(jnp.bfloat16), (0, 0))
    xb = jax.lax.dynamic_update_slice(xb, f2.astype(jnp.bfloat16), (B, 0))
    y = _classblock_pallas(xb, folded, out_dtype=out_dtype)
    C = folded["class_num"]
    return y[:B, :C], y[B:M, :C]


def init_params(key, input_dim, num_bottleneck, class_num):
    """Deterministic init mirroring weights_init_kaiming / weights_init_classifier."""
    k1, k2, k3 = jax.random.split(key, 3)
    # Linear(input_dim, num_bottleneck): kaiming_normal, mode='fan_out' -> std = sqrt(2/out)
    std1 = (2.0 / num_bottleneck) ** 0.5
    w1 = std1 * jax.random.normal(k1, (input_dim, num_bottleneck), jnp.float32)
    b1 = jnp.zeros((1, num_bottleneck), jnp.float32)
    # BatchNorm1d: gamma ~ N(1, 0.02), beta = 0, running stats at defaults
    gamma = 1.0 + 0.02 * jax.random.normal(k2, (1, num_bottleneck), jnp.float32)
    beta = jnp.zeros((1, num_bottleneck), jnp.float32)
    running_mean = jnp.zeros((1, num_bottleneck), jnp.float32)
    running_var = jnp.ones((1, num_bottleneck), jnp.float32)
    # classifier Linear(num_bottleneck, class_num): weight ~ N(0, 0.001), bias = 0
    w2 = 0.001 * jax.random.normal(k3, (num_bottleneck, class_num), jnp.float32)
    b2 = jnp.zeros((1, class_num), jnp.float32)
    return dict(w1=w1, b1=b1, gamma=gamma, beta=beta,
                running_mean=running_mean, running_var=running_var,
                w2=w2, b2=b2)


def class_block_ref(x, p):
    """Pure-JAX f32 reference (un-folded) for correctness checking."""
    h = x @ p["w1"] + p["b1"]
    h = (h - p["running_mean"]) * jax.lax.rsqrt(p["running_var"] + BN_EPS) * p["gamma"] + p["beta"]
    return h @ p["w2"] + p["b2"]


if __name__ == "__main__":
    # Shared ClassBlock(input_dim=64, class_num=16, droprate=0.0, num_bottleneck=128)
    # applied to both views' (stand-in) backbone features, as in multi_view_net.forward.
    B, INPUT_DIM, NUM_BOTTLENECK, CLASS_NUM = 8, 64, 128, 16

    key = jax.random.PRNGKey(0)
    k1, k2, kp = jax.random.split(key, 3)
    f1 = jax.random.normal(k1, (B, INPUT_DIM), jnp.float32)   # view-1 pooled features
    f2 = jax.random.normal(k2, (B, INPUT_DIM), jnp.float32)   # view-2 pooled features
    params = init_params(kp, INPUT_DIM, NUM_BOTTLENECK, CLASS_NUM)
    folded = fold_params(params)

    y1, y2 = multi_view_classifier_forward(f1, f2, folded)
    (y1, y2) = jax.block_until_ready((y1, y2))

    r1 = class_block_ref(f1, params)
    r2 = class_block_ref(f2, params)
    assert y1.shape == (B, CLASS_NUM), y1.shape
    assert y2.shape == (B, CLASS_NUM), y2.shape
    # bf16 MXU operands with f32 accumulation -> loosen tolerance vs the f32 reference.
    assert jnp.allclose(y1, r1, atol=5e-3, rtol=2e-2), "view-1 mismatch vs reference"
    assert jnp.allclose(y2, r2, atol=5e-3, rtol=2e-2), "view-2 mismatch vs reference"

    print("KERNEL_OK")
</pallas_src>

<mosaic_0001>
module attributes {stable_mosaic.version = 11 : i64} {
  func.func @classblock_kernel(%arg0: i32, %arg1: memref<16x128xbf16, #tpu.memory_space<vmem>>, %arg2: memref<128x128xbf16, #tpu.memory_space<vmem>>, %arg3: memref<1x128xf32, #tpu.memory_space<vmem>>, %arg4: memref<128x128xbf16, #tpu.memory_space<vmem>>, %arg5: memref<1x128xf32, #tpu.memory_space<vmem>>, %arg6: memref<16x128xf32, #tpu.memory_space<vmem>>) attributes {dimension_semantics = [#tpu.dimension_semantics<parallel>], iteration_bounds = array<i64: 1>, scalar_prefetch = 0 : i64, scratch_operands = 0 : i64, tpu.core_type = #tpu.core_type<tc>, window_params = [{transform_indices = @transform_0, window_bounds = array<i64: 16, 128>}, {pipeline_mode = #tpu.pipeline_mode<synchronous>, transform_indices = @transform_1, window_bounds = array<i64: 128, 128>}, {pipeline_mode = #tpu.pipeline_mode<synchronous>, transform_indices = @transform_2, window_bounds = array<i64: 1, 128>}, {pipeline_mode = #tpu.pipeline_mode<synchronous>, transform_indices = @transform_3, window_bounds = array<i64: 128, 128>}, {pipeline_mode = #tpu.pipeline_mode<synchronous>, transform_indices = @transform_4, window_bounds = array<i64: 1, 128>}, {transform_indices = @transform_5, window_bounds = array<i64: 16, 128>}]} {
    %c0 = arith.constant 0 : index
    %c0_0 = arith.constant 0 : index
    %0 = vector.load %arg1[%c0, %c0_0] : memref<16x128xbf16, #tpu.memory_space<vmem>>, vector<16x128xbf16>
    %c0_1 = arith.constant 0 : index
    %c0_2 = arith.constant 0 : index
    %1 = vector.load %arg2[%c0_1, %c0_2] : memref<128x128xbf16, #tpu.memory_space<vmem>>, vector<128x128xbf16>
    %cst = arith.constant dense<0.000000e+00> : vector<16x128xf32>
    %2 = tpu.matmul %0, %1, %cst {dimension_numbers = #tpu.dot_dimension_numbers<[1], [0], [0], [1], [0, 0, 1, 1], [], []>} : vector<16x128xbf16>, vector<128x128xbf16>, vector<16x128xf32> -> vector<16x128xf32>
    %c0_3 = arith.constant 0 : index
    %c0_4 = arith.constant 0 : index
    %3 = vector.load %arg3[%c0_3, %c0_4] : memref<1x128xf32, #tpu.memory_space<vmem>>, vector<1x128xf32>
    %4 = vector.broadcast %3 : vector<1x128xf32> to vector<16x128xf32>
    %5 = arith.addf %2, %4 : vector<16x128xf32>
    %6 = arith.truncf %5 : vector<16x128xf32> to vector<16x128xbf16>
    %c0_5 = arith.constant 0 : index
    %c0_6 = arith.constant 0 : index
    %7 = vector.load %arg4[%c0_5, %c0_6] : memref<128x128xbf16, #tpu.memory_space<vmem>>, vector<128x128xbf16>
    %cst_7 = arith.constant dense<0.000000e+00> : vector<16x128xf32>
    %8 = tpu.matmul %6, %7, %cst_7 {dimension_numbers = #tpu.dot_dimension_numbers<[1], [0], [0], [1], [0, 0, 1, 1], [], []>} : vector<16x128xbf16>, vector<128x128xbf16>, vector<16x128xf32> -> vector<16x128xf32>
    %c0_8 = arith.constant 0 : index
    %c0_9 = arith.constant 0 : index
    %9 = vector.load %arg5[%c0_8, %c0_9] : memref<1x128xf32, #tpu.memory_space<vmem>>, vector<1x128xf32>
    %10 = vector.broadcast %9 : vector<1x128xf32> to vector<16x128xf32>
    %11 = arith.addf %8, %10 : vector<16x128xf32>
    %c0_10 = arith.constant 0 : index
    %c0_11 = arith.constant 0 : index
    %12 = vector.load %arg6[%c0_10, %c0_11] : memref<16x128xf32, #tpu.memory_space<vmem>>, vector<16x128xf32>
    tpu.vector_store %arg6[%c0_10, %c0_11], %11 {strides = array<i32>} : memref<16x128xf32, #tpu.memory_space<vmem>>, vector<16x128xf32>,
    return
  }
  func.func @transform_0(%arg0: i32) -> (i32, i32) {
    %c0_i32 = arith.constant 0 : i32
    %c0_i32_0 = arith.constant 0 : i32
    return %arg0, %c0_i32 : i32, i32
  }
  func.func @transform_1(%arg0: i32) -> (i32, i32) {
    %c0_i32 = arith.constant 0 : i32
    %c0_i32_0 = arith.constant 0 : i32
    %c0_i32_1 = arith.constant 0 : i32
    return %c0_i32, %c0_i32_0 : i32, i32
  }
  func.func @transform_2(%arg0: i32) -> (i32, i32) {
    %c0_i32 = arith.constant 0 : i32
    %c0_i32_0 = arith.constant 0 : i32
    %c0_i32_1 = arith.constant 0 : i32
    return %c0_i32, %c0_i32_0 : i32, i32
  }
  func.func @transform_3(%arg0: i32) -> (i32, i32) {
    %c0_i32 = arith.constant 0 : i32
    %c0_i32_0 = arith.constant 0 : i32
    %c0_i32_1 = arith.constant 0 : i32
    return %c0_i32, %c0_i32_0 : i32, i32
  }
  func.func @transform_4(%arg0: i32) -> (i32, i32) {
    %c0_i32 = arith.constant 0 : i32
    %c0_i32_0 = arith.constant 0 : i32
    %c0_i32_1 = arith.constant 0 : i32
    return %c0_i32, %c0_i32_0 : i32, i32
  }
  func.func @transform_5(%arg0: i32) -> (i32, i32) {
    %c0_i32 = arith.constant 0 : i32
    %c0_i32_0 = arith.constant 0 : i32
    return %arg0, %c0_i32 : i32, i32
  }
}

module attributes {stable_mosaic.version = 11 : i64} {
  func.func @classblock_kernel(%arg0: i32, %arg1: memref<16x128xbf16, #tpu.memory_space<vmem>>, %arg2: memref<128x128xbf16, #tpu.memory_space<vmem>>, %arg3: memref<1x128xf32, #tpu.memory_space<vmem>>, %arg4: memref<128x128xbf16, #tpu.memory_space<vmem>>, %arg5: memref<1x128xf32, #tpu.memory_space<vmem>>, %arg6: memref<16x128xf32, #tpu.memory_space<vmem>>) attributes {dimension_semantics = [#tpu.dimension_semantics<parallel>], iteration_bounds = array<i64: 1>, scalar_prefetch = 0 : i64, scratch_operands = 0 : i64, tpu.core_type = #tpu.core_type<tc>, window_params = [{transform_indices = @transform_0, window_bounds = array<i64: 16, 128>}, {pipeline_mode = #tpu.pipeline_mode<synchronous>, transform_indices = @transform_1, window_bounds = array<i64: 128, 128>}, {pipeline_mode = #tpu.pipeline_mode<synchronous>, transform_indices = @transform_2, window_bounds = array<i64: 1, 128>}, {pipeline_mode = #tpu.pipeline_mode<synchronous>, transform_indices = @transform_3, window_bounds = array<i64: 128, 128>}, {pipeline_mode = #tpu.pipeline_mode<synchronous>, transform_indices = @transform_4, window_bounds = array<i64: 1, 128>}, {transform_indices = @transform_5, window_bounds = array<i64: 16, 128>}]} {
    %c0 = arith.constant 0 : index
    %c0_0 = arith.constant 0 : index
    %0 = vector.load %arg1[%c0, %c0_0] : memref<16x128xbf16, #tpu.memory_space<vmem>>, vector<16x128xbf16>
    %c0_1 = arith.constant 0 : index
    %c0_2 = arith.constant 0 : index
    %1 = vector.load %arg2[%c0_1, %c0_2] : memref<128x128xbf16, #tpu.memory_space<vmem>>, vector<128x128xbf16>
    %cst = arith.constant dense<0.000000e+00> : vector<16x128xf32>
    %2 = tpu.matmul %0, %1, %cst {dimension_numbers = #tpu.dot_dimension_numbers<[1], [0], [0], [1], [0, 0, 1, 1], [], []>} : vector<16x128xbf16>, vector<128x128xbf16>, vector<16x128xf32> -> vector<16x128xf32>
    %c0_3 = arith.constant 0 : index
    %c0_4 = arith.constant 0 : index
    %3 = vector.load %arg3[%c0_3, %c0_4] : memref<1x128xf32, #tpu.memory_space<vmem>>, vector<1x128xf32>
    %4 = vector.broadcast %3 : vector<1x128xf32> to vector<16x128xf32>
    %5 = arith.addf %2, %4 : vector<16x128xf32>
    %6 = arith.truncf %5 : vector<16x128xf32> to vector<16x128xbf16>
    %c0_5 = arith.constant 0 : index
    %c0_6 = arith.constant 0 : index
    %7 = vector.load %arg4[%c0_5, %c0_6] : memref<128x128xbf16, #tpu.memory_space<vmem>>, vector<128x128xbf16>
    %cst_7 = arith.constant dense<0.000000e+00> : vector<16x128xf32>
    %8 = tpu.matmul %6, %7, %cst_7 {dimension_numbers = #tpu.dot_dimension_numbers<[1], [0], [0], [1], [0, 0, 1, 1], [], []>} : vector<16x128xbf16>, vector<128x128xbf16>, vector<16x128xf32> -> vector<16x128xf32>
    %c0_8 = arith.constant 0 : index
    %c0_9 = arith.constant 0 : index
    %9 = vector.load %arg5[%c0_8, %c0_9] : memref<1x128xf32, #tpu.memory_space<vmem>>, vector<1x128xf32>
    %10 = vector.broadcast %9 : vector<1x128xf32> to vector<16x128xf32>
    %11 = arith.addf %8, %10 : vector<16x128xf32>
    %c0_10 = arith.constant 0 : index
    %c0_11 = arith.constant 0 : index
    %12 = vector.load %arg6[%c0_10, %c0_11] : memref<16x128xf32, #tpu.memory_space<vmem>>, vector<16x128xf32>
    tpu.vector_store %arg6[%c0_10, %c0_11], %11 {strides = array<i32>} : memref<16x128xf32, #tpu.memory_space<vmem>>, vector<16x128xf32>,
    return
  }
  func.func @transform_0(%arg0: i32) -> (i32, i32) {
    %c0_i32 = arith.constant 0 : i32
    %c0_i32_0 = arith.constant 0 : i32
    return %arg0, %c0_i32 : i32, i32
  }
  func.func @transform_1(%arg0: i32) -> (i32, i32) {
    %c0_i32 = arith.constant 0 : i32
    %c0_i32_0 = arith.constant 0 : i32
    %c0_i32_1 = arith.constant 0 : i32
    return %c0_i32, %c0_i32_0 : i32, i32
  }
  func.func @transform_2(%arg0: i32) -> (i32, i32) {
    %c0_i32 = arith.constant 0 : i32
    %c0_i32_0 = arith.constant 0 : i32
    %c0_i32_1 = arith.constant 0 : i32
    return %c0_i32, %c0_i32_0 : i32, i32
  }
  func.func @transform_3(%arg0: i32) -> (i32, i32) {
    %c0_i32 = arith.constant 0 : i32
    %c0_i32_0 = arith.constant 0 : i32
    %c0_i32_1 = arith.constant 0 : i32
    return %c0_i32, %c0_i32_0 : i32, i32
  }
  func.func @transform_4(%arg0: i32) -> (i32, i32) {
    %c0_i32 = arith.constant 0 : i32
    %c0_i32_0 = arith.constant 0 : i32
    %c0_i32_1 = arith.constant 0 : i32
    return %c0_i32, %c0_i32_0 : i32, i32
  }
  func.func @transform_5(%arg0: i32) -> (i32, i32) {
    %c0_i32 = arith.constant 0 : i32
    %c0_i32_0 = arith.constant 0 : i32
    return %arg0, %c0_i32 : i32, i32
  }
}

</mosaic_0001>

<bundles_post_ra>
// kernel: tpu_custom_call.1
= control target key start
LH: loop header
LB: loop body
LE: loop exit
PB: predicated region body
PF: predicated region fallthrough
CT: control target
= control target key end

     0   :  { %10 = vsyncpa [#allocation3], 0  ;;  %s564_s0 = inlined_call_operand.hbm [shape: bf16[16,128], index: 0, kind: input, shape index: {}]   ;;  %s565_s1 = inlined_call_operand.hbm [shape: bf16[128,128], index: 1, kind: input, shape index: {}]   ;;  %s566_s2 = inlined_call_operand.vmem [shape: f32[1,128], index: 2, kind: input, shape index: {}]   ;;  %s567_s3 = inlined_call_operand.hbm [shape: bf16[128,128], index: 3, kind: input, shape index: {}]   ;;  %s568_s4 = inlined_call_operand.vmem [shape: f32[1,128], index: 4, kind: input, shape index: {}]   ;;  %s569_s5 = inlined_call_operand.hbm [shape: f32[16,128], index: 5, kind: output, shape index: {}]  }
   0x1   :  { %11 = vsyncpa [#allocation6], 0 }
   0x2   :  { %12 = vsyncpa [#allocation4], 0  ;;  %s506_s18 = smov [#allocation5]   ;;  %s507_s20 = smov [#allocation2]  }
   0x3   :  { %s30_s19 = sshll.u32 %s506_s18, 4  ;;  %s18_s21 = sshll.u32 %s507_s20, 4  ;;  %s31_s19 = int_to_ptr.vmem [resolvable:$true] %s30_s19  ;;  %s19_s21 = int_to_ptr.vmem [resolvable:$true] %s18_s21 }
   0x4   :  { %s428_s22 = scalar_lea.vmem %s31_s19, 1024  ;;  %p433_p1 = scmp.lt.s32.totalorder %s31_s19, %s31_s19 }
   0x5   :  { %p429_p0 = scmp.ne.s32.totalorder %s31_s19, %s428_s22  ;;  %p434_p2 = scmp.lt.s32.totalorder %s428_s22, %s428_s22 }
   0x7   :  { %p435_p3 = por %p434_p2, %p433_p1 }
   0x9   :  { %p436_p4 = pnand %p435_p3, %p429_p0 }
   0xb   :  { %439 = shalt.err (!%p436_p4)
}
   0xc   :  { %s508_s23 = smov 64   ;;  %s509_s24 = smov 4  }
   0xd   :  { %36 = dma.hbm_to_vmem [thread:$0]  %s565_s1, 1024, %s31_s19, [#allocation6], %s508_s23, %s508_s23, %s509_s24  }
   0xe   :  { %s448_s27 = scalar_lea.vmem %s19_s21, 128  ;;  %p453_p6 = scmp.lt.s32.totalorder %s19_s21, %s19_s21 }
   0xf   :  { %p449_p5 = scmp.ne.s32.totalorder %s19_s21, %s448_s27  ;;  %p454_p7 = scmp.lt.s32.totalorder %s448_s27, %s448_s27 }
  0x11   :  { %p455_p8 = por %p454_p7, %p453_p6 }
  0x13   :  { %p456_p9 = pnand %p455_p8, %p449_p5 }
  0x15   :  { %459 = shalt.err (!%p456_p9)
}
  0x16   :  { %24 = dma.hbm_to_vmem [thread:$0]  %s564_s0, 128, %s19_s21, [#allocation3], %s508_s23, %s508_s23, %s509_s24  }
  0x17   :  { %s510_s30 = smov [#allocation7]  }
  0x18   :  { %s44_s6 = sshll.u32 %s510_s30, 4  ;;  %s45_s6 = int_to_ptr.vmem [resolvable:$true] %s44_s6 }
  0x19   :  { %s468_s7 = scalar_lea.vmem %s45_s6, 1024  ;;  %p473_p11 = scmp.lt.s32.totalorder %s45_s6, %s45_s6 }
  0x1a   :  { %p469_p10 = scmp.ne.s32.totalorder %s45_s6, %s468_s7  ;;  %p474_p12 = scmp.lt.s32.totalorder %s468_s7, %s468_s7 }
  0x1c   :  { %p475_p13 = por %p474_p12, %p473_p11 }
  0x1e   :  { %p476_p0 = pnand %p475_p13, %p469_p10 }
  0x20   :  { %479 = shalt.err (!%p476_p0)
}
  0x21   :  { %50 = dma.hbm_to_vmem [thread:$0]  %s567_s3, 1024, %s45_s6, [#allocation6], %s508_s23, %s508_s23, %s509_s24  }
  0x22   :  { %500 = dma.done.wait [#allocation3], 128  }
  0x23   :  { %501 = vsyncadd [#allocation3], 4294967168 }
  0x24   :  { %502 = dma.done.wait [#allocation6], 2048  }
  0x25   :  { %503 = vsyncadd [#allocation6], 4294965248  ;;  %v511_v0 = vmov 0.0   ;;  %vm512_vm0 = vmmov 0   ;;  %v403_v1 = vld [vmem:[#allocation5 + $0x38] sm:$0xff]   ;;  %v404_v2 = vld [vmem:[#allocation5 + $0x30] sm:$0xff]  }
  0x26   :  { %353 = vmatprep.subr.bf16.mxu0 %v511_v0  ;;  %369 = vmatprep.mubr.msk.bf16.mxu0 %vm512_vm0, %v511_v0  ;;  %v405_v3 = vld [vmem:[#allocation5 + $0x28] sm:$0xff]   ;;  %v412_v4 = vld [vmem:[#allocation7 + $0x38] sm:$0xff]   ;;  %v406_v5 = vld [vmem:[#allocation5 + $0x20] sm:$0xff]   ;;  %s513_s11 = smov [#allocation8]  }
  0x27   :  { %373 = vmatprep.subr.bf16.mxu1 %v511_v0  ;;  %389 = vmatprep.mubr.msk.bf16.mxu1 %vm512_vm0, %v511_v0  ;;  %v413_v6 = vld [vmem:[#allocation7 + $0x30] sm:$0xff]   ;;  %v407_v7 = vld [vmem:[#allocation5 + $0x18] sm:$0xff]   ;;  %v414_v8 = vld [vmem:[#allocation7 + $0x28] sm:$0xff]   ;;  %s303_s12 = sshll.u32 %s513_s11, 4  ;;  %s304_s12 = int_to_ptr.vmem [resolvable:$true] %s303_s12 }
  0x28   :  { %354 = vmatpush3.bf16.msra.mxu0 %v403_v1  ;;  %374 = vmatpush3.bf16.msra.mxu1 %v412_v4  ;;  %v408_v9 = vld [vmem:[#allocation5 + $0x10] sm:$0xff]   ;;  %v415_v10 = vld [vmem:[#allocation7 + $0x20] sm:$0xff]   ;;  %v409_v11 = vld [vmem:[#allocation5 + $0x8] sm:$0xff]   ;;  %p485_p2 = scmp.lt.s32.totalorder %s304_s12, %s304_s12 }
  0x29   :  { %355 = vmatprep.subr.bf16.mxu0 %v511_v0  ;;  %375 = vmatprep.subr.bf16.mxu1 %v511_v0  ;;  %v416_v12 = vld [vmem:[#allocation7 + $0x18] sm:$0xff]   ;;  %v410_v13 = vld [vmem:[#allocation5] sm:$0xff]   ;;  %v417_v14 = vld [vmem:[#allocation7 + $0x10] sm:$0xff]  }
  0x2a   :  { %v411_v15 = vld [vmem:[#allocation2] sm:$0xff]   ;;  %v418_v16 = vld [vmem:[#allocation7 + $0x8] sm:$0xff]   ;;  %v419_v17 = vld [vmem:[#allocation7] sm:$0xff]  }
  0x2b   :  { %v316_v19 = vld [vmem:[%s566_s2] ss:$0 sm:$0xff]  ;;  %s480_s2 = scalar_lea.vmem %s304_s12, 256 }
  0x2c   :  { %356 = vmatpush3.bf16.msra.mxu0 %v404_v2  ;;  %376 = vmatpush3.bf16.msra.mxu1 %v413_v6  ;;  %v326_v26 = vld [vmem:[%s568_s4] ss:$0 sm:$0xff]  ;;  %p481_p1 = scmp.ne.s32.totalorder %s304_s12, %s480_s2  ;;  %p486_p3 = scmp.lt.s32.totalorder %s480_s2, %s480_s2 }
  0x2d   :  { %357 = vmatprep.subr.bf16.mxu0 %v511_v0  ;;  %377 = vmatprep.subr.bf16.mxu1 %v511_v0 }
  0x2e   :  { %p487_p4 = por %p486_p3, %p485_p2 }
  0x30   :  { %358 = vmatpush3.bf16.msra.mxu0 %v405_v3  ;;  %378 = vmatpush3.bf16.msra.mxu1 %v414_v8  ;;  %p488_p5 = pnand %p487_p4, %p481_p1 }
  0x31   :  { %359 = vmatprep.subr.bf16.mxu0 %v511_v0  ;;  %379 = vmatprep.subr.bf16.mxu1 %v511_v0 }
  0x34   :  { %360 = vmatpush3.bf16.msra.mxu0 %v406_v5  ;;  %380 = vmatpush3.bf16.msra.mxu1 %v415_v10 }
  0x35   :  { %361 = vmatprep.subr.bf16.mxu0 %v511_v0  ;;  %381 = vmatprep.subr.bf16.mxu1 %v511_v0 }
  0x38   :  { %362 = vmatpush3.bf16.msra.mxu0 %v407_v7  ;;  %382 = vmatpush3.bf16.msra.mxu1 %v416_v12 }
  0x39   :  { %363 = vmatprep.subr.bf16.mxu0 %v511_v0  ;;  %383 = vmatprep.subr.bf16.mxu1 %v511_v0 }
  0x3c   :  { %364 = vmatpush3.bf16.msra.mxu0 %v408_v9  ;;  %384 = vmatpush3.bf16.msra.mxu1 %v417_v14 }
  0x3d   :  { %365 = vmatprep.subr.bf16.mxu0 %v511_v0  ;;  %385 = vmatprep.subr.bf16.mxu1 %v511_v0 }
  0x40   :  { %366 = vmatpush3.bf16.msra.mxu0 %v409_v11  ;;  %386 = vmatpush3.bf16.msra.mxu1 %v418_v16 }
  0x41   :  { %367 = vmatprep.subr.bf16.mxu0 %v511_v0  ;;  %387 = vmatprep.subr.bf16.mxu1 %v511_v0 }
  0x44   :  { %368 = vmatpush3.bf16.msra.mxu0 %v410_v13  ;;  %388 = vmatpush3.bf16.msra.mxu1 %v419_v17 }
  0x47   :  { %370 = vmatmul.mubr.bf16.vlgmr.msra.gmra.mxu0 %v411_v15 }
 0x107   :  { %v176_v18 = vpop.f32.mrf.mxu0 }
 0x108   :  { %v177_v22 = vadd.f32 %v316_v19, %v176_v18 }
 0x109   :  { %v371_v20 = vpop.f32.mrf.mxu0 }
 0x10b   :  { %v179_v21 = vpop.f32.mrf.mxu0 }
 0x10c   :  { %v180_v23 = vadd.f32 %v316_v19, %v179_v21 }
 0x10d   :  { %v372_v24 = vpop.f32.mrf.mxu0 }
 0x10e   :  { %v183_v25 = vpack.c.bf16 %v180_v23, %v177_v22 }
 0x110   :  { %390 = vmatmul.mubr.bf16.vlgmr.msra.gmra.mxu1 %v183_v25 }
 0x1d0   :  { %v289_v27 = vpop.f32.mrf.mxu1 }
 0x1d1   :  { %v290_v28 = vadd.f32 %v326_v26, %v289_v27 }
 0x1d2   :  { %v391_v29 = vpop.f32.mrf.mxu1 }
 0x1d3   :  { %296 = vst [vmem:[#allocation8] sm:$0xff] %v290_v28 }
 0x1d4   :  { %v292_v30 = vpop.f32.mrf.mxu1 }
 0x1d5   :  { %v293_v31 = vadd.f32 %v326_v26, %v292_v30 }
 0x1d6   :  { %v392_v32 = vpop.f32.mrf.mxu1 }
 0x1d7   :  { %297 = vst [vmem:[#allocation8 + $0x8] sm:$0xff] %v293_v31 }
 0x1d8   :  { %491 = shalt.err (!%p488_p5)
}
 0x1d9   :  { %s514_s13 = smov 128   ;;  %s515_s4 = smov 8  }
 0x1da   :  { %309 = dma.vmem_to_hbm [thread:$0]  %s304_s12, 256, %s569_s5, [#allocation4], %s514_s13, %s514_s13, %s515_s4  }
 0x1db   :  { %504 = dma.done.wait [#allocation4], 256  }
 0x1dc   :  { %505 = vsyncadd [#allocation4], 4294967040 }
 0x1dd   :  { %313 = vsyncpa [#allocation3], 1 }
 0x1de   :  { %314 = vsyncpa [#allocation6], 1 }
 0x1df   :  { %315 = vsyncpa [#allocation4], 1 }

// kernel: tpu_custom_call.1
= control target key start
LH: loop header
LB: loop body
LE: loop exit
PB: predicated region body
PF: predicated region fallthrough
CT: control target
= control target key end

     0   :  { %10 = vsyncpa [#allocation3], 0  ;;  %s564_s0 = inlined_call_operand.hbm [shape: bf16[16,128], index: 0, kind: input, shape index: {}]   ;;  %s565_s1 = inlined_call_operand.hbm [shape: bf16[128,128], index: 1, kind: input, shape index: {}]   ;;  %s566_s2 = inlined_call_operand.vmem [shape: f32[1,128], index: 2, kind: input, shape index: {}]   ;;  %s567_s3 = inlined_call_operand.hbm [shape: bf16[128,128], index: 3, kind: input, shape index: {}]   ;;  %s568_s4 = inlined_call_operand.vmem [shape: f32[1,128], index: 4, kind: input, shape index: {}]   ;;  %s569_s5 = inlined_call_operand.hbm [shape: f32[16,128], index: 5, kind: output, shape index: {}]  }
   0x1   :  { %11 = vsyncpa [#allocation6], 0 }
   0x2   :  { %12 = vsyncpa [#allocation4], 0  ;;  %s506_s18 = smov [#allocation5]   ;;  %s507_s20 = smov [#allocation2]  }
   0x3   :  { %s30_s19 = sshll.u32 %s506_s18, 4  ;;  %s18_s21 = sshll.u32 %s507_s20, 4  ;;  %s31_s19 = int_to_ptr.vmem [resolvable:$true] %s30_s19  ;;  %s19_s21 = int_to_ptr.vmem [resolvable:$true] %s18_s21 }
   0x4   :  { %s428_s22 = scalar_lea.vmem %s31_s19, 1024  ;;  %p433_p1 = scmp.lt.s32.totalorder %s31_s19, %s31_s19 }
   0x5   :  { %p429_p0 = scmp.ne.s32.totalorder %s31_s19, %s428_s22  ;;  %p434_p2 = scmp.lt.s32.totalorder %s428_s22, %s428_s22 }
   0x7   :  { %p435_p3 = por %p434_p2, %p433_p1 }
   0x9   :  { %p436_p4 = pnand %p435_p3, %p429_p0 }
   0xb   :  { %439 = shalt.err (!%p436_p4)
}
   0xc   :  { %s508_s23 = smov 64   ;;  %s509_s24 = smov 4  }
   0xd   :  { %36 = dma.hbm_to_vmem [thread:$0]  %s565_s1, 1024, %s31_s19, [#allocation6], %s508_s23, %s508_s23, %s509_s24  }
   0xe   :  { %s448_s27 = scalar_lea.vmem %s19_s21, 128  ;;  %p453_p6 = scmp.lt.s32.totalorder %s19_s21, %s19_s21 }
   0xf   :  { %p449_p5 = scmp.ne.s32.totalorder %s19_s21, %s448_s27  ;;  %p454_p7 = scmp.lt.s32.totalorder %s448_s27, %s448_s27 }
  0x11   :  { %p455_p8 = por %p454_p7, %p453_p6 }
  0x13   :  { %p456_p9 = pnand %p455_p8, %p449_p5 }
  0x15   :  { %459 = shalt.err (!%p456_p9)
}
  0x16   :  { %24 = dma.hbm_to_vmem [thread:$0]  %s564_s0, 128, %s19_s21, [#allocation3], %s508_s23, %s508_s23, %s509_s24  }
  0x17   :  { %s510_s30 = smov [#allocation7]  }
  0x18   :  { %s44_s6 = sshll.u32 %s510_s30, 4  ;;  %s45_s6 = int_to_ptr.vmem [resolvable:$true] %s44_s6 }
  0x19   :  { %s468_s7 = scalar_lea.vmem %s45_s6, 1024  ;;  %p473_p11 = scmp.lt.s32.totalorder %s45_s6, %s45_s6 }
  0x1a   :  { %p469_p10 = scmp.ne.s32.totalorder %s45_s6, %s468_s7  ;;  %p474_p12 = scmp.lt.s32.totalorder %s468_s7, %s468_s7 }
  0x1c   :  { %p475_p13 = por %p474_p12, %p473_p11 }
  0x1e   :  { %p476_p0 = pnand %p475_p13, %p469_p10 }
  0x20   :  { %479 = shalt.err (!%p476_p0)
}
  0x21   :  { %50 = dma.hbm_to_vmem [thread:$0]  %s567_s3, 1024, %s45_s6, [#allocation6], %s508_s23, %s508_s23, %s509_s24  }
  0x22   :  { %500 = dma.done.wait [#allocation3], 128  }
  0x23   :  { %501 = vsyncadd [#allocation3], 4294967168 }
  0x24   :  { %502 = dma.done.wait [#allocation6], 2048  }
  0x25   :  { %503 = vsyncadd [#allocation6], 4294965248  ;;  %v511_v0 = vmov 0.0   ;;  %vm512_vm0 = vmmov 0   ;;  %v403_v1 = vld [vmem:[#allocation5 + $0x38] sm:$0xff]   ;;  %v404_v2 = vld [vmem:[#allocation5 + $0x30] sm:$0xff]  }
  0x26   :  { %353 = vmatprep.subr.bf16.mxu0 %v511_v0  ;;  %369 = vmatprep.mubr.msk.bf16.mxu0 %vm512_vm0, %v511_v0  ;;  %v405_v3 = vld [vmem:[#allocation5 + $0x28] sm:$0xff]   ;;  %v412_v4 = vld [vmem:[#allocation7 + $0x38] sm:$0xff]   ;;  %v406_v5 = vld [vmem:[#allocation5 + $0x20] sm:$0xff]   ;;  %s513_s11 = smov [#allocation8]  }
  0x27   :  { %373 = vmatprep.subr.bf16.mxu1 %v511_v0  ;;  %389 = vmatprep.mubr.msk.bf16.mxu1 %vm512_vm0, %v511_v0  ;;  %v413_v6 = vld [vmem:[#allocation7 + $0x30] sm:$0xff]   ;;  %v407_v7 = vld [vmem:[#allocation5 + $0x18] sm:$0xff]   ;;  %v414_v8 = vld [vmem:[#allocation7 + $0x28] sm:$0xff]   ;;  %s303_s12 = sshll.u32 %s513_s11, 4  ;;  %s304_s12 = int_to_ptr.vmem [resolvable:$true] %s303_s12 }
  0x28   :  { %354 = vmatpush3.bf16.msra.mxu0 %v403_v1  ;;  %374 = vmatpush3.bf16.msra.mxu1 %v412_v4  ;;  %v408_v9 = vld [vmem:[#allocation5 + $0x10] sm:$0xff]   ;;  %v415_v10 = vld [vmem:[#allocation7 + $0x20] sm:$0xff]   ;;  %v409_v11 = vld [vmem:[#allocation5 + $0x8] sm:$0xff]   ;;  %p485_p2 = scmp.lt.s32.totalorder %s304_s12, %s304_s12 }
  0x29   :  { %355 = vmatprep.subr.bf16.mxu0 %v511_v0  ;;  %375 = vmatprep.subr.bf16.mxu1 %v511_v0  ;;  %v416_v12 = vld [vmem:[#allocation7 + $0x18] sm:$0xff]   ;;  %v410_v13 = vld [vmem:[#allocation5] sm:$0xff]   ;;  %v417_v14 = vld [vmem:[#allocation7 + $0x10] sm:$0xff]  }
  0x2a   :  { %v411_v15 = vld [vmem:[#allocation2] sm:$0xff]   ;;  %v418_v16 = vld [vmem:[#allocation7 + $0x8] sm:$0xff]   ;;  %v419_v17 = vld [vmem:[#allocation7] sm:$0xff]  }
  0x2b   :  { %v316_v19 = vld [vmem:[%s566_s2] ss:$0 sm:$0xff]  ;;  %s480_s2 = scalar_lea.vmem %s304_s12, 256 }
  0x2c   :  { %356 = vmatpush3.bf16.msra.mxu0 %v404_v2  ;;  %376 = vmatpush3.bf16.msra.mxu1 %v413_v6  ;;  %v326_v26 = vld [vmem:[%s568_s4] ss:$0 sm:$0xff]  ;;  %p481_p1 = scmp.ne.s32.totalorder %s304_s12, %s480_s2  ;;  %p486_p3 = scmp.lt.s32.totalorder %s480_s2, %s480_s2 }
  0x2d   :  { %357 = vmatprep.subr.bf16.mxu0 %v511_v0  ;;  %377 = vmatprep.subr.bf16.mxu1 %v511_v0 }
  0x2e   :  { %p487_p4 = por %p486_p3, %p485_p2 }
  0x30   :  { %358 = vmatpush3.bf16.msra.mxu0 %v405_v3  ;;  %378 = vmatpush3.bf16.msra.mxu1 %v414_v8  ;;  %p488_p5 = pnand %p487_p4, %p481_p1 }
  0x31   :  { %359 = vmatprep.subr.bf16.mxu0 %v511_v0  ;;  %379 = vmatprep.subr.bf16.mxu1 %v511_v0 }
  0x34   :  { %360 = vmatpush3.bf16.msra.mxu0 %v406_v5  ;;  %380 = vmatpush3.bf16.msra.mxu1 %v415_v10 }
  0x35   :  { %361 = vmatprep.subr.bf16.mxu0 %v511_v0  ;;  %381 = vmatprep.subr.bf16.mxu1 %v511_v0 }
  0x38   :  { %362 = vmatpush3.bf16.msra.mxu0 %v407_v7  ;;  %382 = vmatpush3.bf16.msra.mxu1 %v416_v12 }
  0x39   :  { %363 = vmatprep.subr.bf16.mxu0 %v511_v0  ;;  %383 = vmatprep.subr.bf16.mxu1 %v511_v0 }
  0x3c   :  { %364 = vmatpush3.bf16.msra.mxu0 %v408_v9  ;;  %384 = vmatpush3.bf16.msra.mxu1 %v417_v14 }
  0x3d   :  { %365 = vmatprep.subr.bf16.mxu0 %v511_v0  ;;  %385 = vmatprep.subr.bf16.mxu1 %v511_v0 }
  0x40   :  { %366 = vmatpush3.bf16.msra.mxu0 %v409_v11  ;;  %386 = vmatpush3.bf16.msra.mxu1 %v418_v16 }
  0x41   :  { %367 = vmatprep.subr.bf16.mxu0 %v511_v0  ;;  %387 = vmatprep.subr.bf16.mxu1 %v511_v0 }
  0x44   :  { %368 = vmatpush3.bf16.msra.mxu0 %v410_v13  ;;  %388 = vmatpush3.bf16.msra.mxu1 %v419_v17 }
  0x47   :  { %370 = vmatmul.mubr.bf16.vlgmr.msra.gmra.mxu0 %v411_v15 }
 0x107   :  { %v176_v18 = vpop.f32.mrf.mxu0 }
 0x108   :  { %v177_v22 = vadd.f32 %v316_v19, %v176_v18 }
 0x109   :  { %v371_v20 = vpop.f32.mrf.mxu0 }
 0x10b   :  { %v179_v21 = vpop.f32.mrf.mxu0 }
 0x10c   :  { %v180_v23 = vadd.f32 %v316_v19, %v179_v21 }
 0x10d   :  { %v372_v24 = vpop.f32.mrf.mxu0 }
 0x10e   :  { %v183_v25 = vpack.c.bf16 %v180_v23, %v177_v22 }
 0x110   :  { %390 = vmatmul.mubr.bf16.vlgmr.msra.gmra.mxu1 %v183_v25 }
 0x1d0   :  { %v289_v27 = vpop.f32.mrf.mxu1 }
 0x1d1   :  { %v290_v28 = vadd.f32 %v326_v26, %v289_v27 }
 0x1d2   :  { %v391_v29 = vpop.f32.mrf.mxu1 }
 0x1d3   :  { %296 = vst [vmem:[#allocation8] sm:$0xff] %v290_v28 }
 0x1d4   :  { %v292_v30 = vpop.f32.mrf.mxu1 }
 0x1d5   :  { %v293_v31 = vadd.f32 %v326_v26, %v292_v30 }
 0x1d6   :  { %v392_v32 = vpop.f32.mrf.mxu1 }
 0x1d7   :  { %297 = vst [vmem:[#allocation8 + $0x8] sm:$0xff] %v293_v31 }
 0x1d8   :  { %491 = shalt.err (!%p488_p5)
}
 0x1d9   :  { %s514_s13 = smov 128   ;;  %s515_s4 = smov 8  }
 0x1da   :  { %309 = dma.vmem_to_hbm [thread:$0]  %s304_s12, 256, %s569_s5, [#allocation4], %s514_s13, %s514_s13, %s515_s4  }
 0x1db   :  { %504 = dma.done.wait [#allocation4], 256  }
 0x1dc   :  { %505 = vsyncadd [#allocation4], 4294967040 }
 0x1dd   :  { %313 = vsyncpa [#allocation3], 1 }
 0x1de   :  { %314 = vsyncpa [#allocation6], 1 }
 0x1df   :  { %315 = vsyncpa [#allocation4], 1 }

</bundles_post_ra>
